<compile_context>
chip_gen: v7x
topology: tpu7x:2x2x1
jax: 0.10.0
libtpu: 0.0.40
codegen_flags: <defaults>
</compile_context>

<pallas_src>
import numpy as np
from functools import partial

import jax
import jax.numpy as jnp
from jax.experimental import pallas as pl
from jax.experimental.pallas import tpu as pltpu


# ----------------------------------------------------------------------------- utils
def _round_up(x, m):
    return ((x + m - 1) // m) * m


_MAX_K_BLOCK = 2048          # single-block K threshold (x block <= 2 MiB f32 at TM=256)
_K_TILE = 1024               # K reduction tile when K > _MAX_K_BLOCK
_VMEM_LIMIT = 32 * 1024 * 1024  # safe on v5e/v6e/v7x; blocks are bounded well below this


def _choose_tm(M):
    """Row-tile size; aim for >=2 row tiles so both v7x TensorCores get work."""
    if M >= 1024:
        return 256
    if M >= 16:
        return min(256, _round_up((M + 1) // 2, 8))
    return _round_up(max(M, 1), 8)


# ----------------------------------------------------------------------------- fused matmul kernel
def _mm_fused_kernel(*refs, n_res, relu, dual, res_after_act):
    # refs = (x, w, scale, bias, res..., out[, out_relu], acc_scratch)
    x_ref, w_ref, s_ref, b_ref = refs[:4]
    res_refs = refs[4:4 + n_res]
    n_out = 2 if dual else 1
    out_refs = refs[4 + n_res:4 + n_res + n_out]
    acc_ref = refs[4 + n_res + n_out]
    k = pl.program_id(1)

    @pl.when(k == 0)
    def _():
        acc_ref[...] = jnp.zeros_like(acc_ref)

    # bf16 operands on the MXU, f32 accumulation.
    acc_ref[...] += jnp.dot(x_ref[...].astype(jnp.bfloat16), w_ref[...],
                            preferred_element_type=jnp.float32)

    @pl.when(k == pl.num_programs(1) - 1)
    def _():
        acc = acc_ref[...] * s_ref[...] + b_ref[...]
        if not res_after_act:
            for r in res_refs:
                acc = acc + r[...]
        if dual:
            out_refs[0][...] = acc                     # pre-ReLU (kept for later residuals)
            out_refs[1][...] = jnp.maximum(acc, 0.0)   # post-ReLU
        else:
            if relu:
                acc = jnp.maximum(acc, 0.0)
            if res_after_act:
                for r in res_refs:
                    acc = acc + r[...]
            out_refs[0][...] = acc


def matmul_fused(x, w, scale, bias, residuals=(), *, relu=False, dual=False,
                 res_after_act=False):
    """out = [relu]((x @ w) * scale + bias + sum(residuals)).
    x:(M,K) f32, w:(K,N) bf16 (precomputed), scale/bias:(N,), residuals broadcastable to (M,N).
    dual=True returns (pre_relu, post_relu)."""
    assert not (dual and res_after_act)
    M, K = x.shape
    Kw, N = w.shape
    assert K == Kw
    TM = _choose_tm(M)

    if K <= _MAX_K_BLOCK:
        TK, Kp = K, K                     # full-K block (exact, no padding needed)
    else:
        TK = _K_TILE
        Kp = _round_up(K, TK)             # zero-pad K: benign for the reduction
        x = jnp.pad(x, ((0, 0), (0, Kp - K)))
        w = jnp.pad(w, ((0, Kp - K), (0, 0)))

    grid = (pl.cdiv(M, TM), Kp // TK)     # partial M edge blocks OK (writes masked); K exact
    scale2 = scale.reshape(1, N).astype(jnp.float32)
    bias2 = bias.reshape(1, N).astype(jnp.float32)
    res2 = tuple(r.reshape(M, N) for r in residuals)

    in_specs = [
        pl.BlockSpec((TM, TK), lambda i, k: (i, k)),
        pl.BlockSpec((TK, N), lambda i, k: (k, 0)),
        pl.BlockSpec((1, N), lambda i, k: (0, 0)),
        pl.BlockSpec((1, N), lambda i, k: (0, 0)),
    ] + [pl.BlockSpec((TM, N), lambda i, k: (i, 0)) for _ in res2]

    out_block = pl.BlockSpec((TM, N), lambda i, k: (i, 0))
    if dual:
        out_shape = (jax.ShapeDtypeStruct((M, N), jnp.float32),
                     jax.ShapeDtypeStruct((M, N), jnp.float32))
        out_specs = (out_block, out_block)
    else:
        out_shape = jax.ShapeDtypeStruct((M, N), jnp.float32)
        out_specs = out_block

    return pl.pallas_call(
        partial(_mm_fused_kernel, n_res=len(res2), relu=relu, dual=dual,
                res_after_act=res_after_act),
        out_shape=out_shape,
        grid=grid,
        in_specs=in_specs,
        out_specs=out_specs,
        scratch_shapes=[pltpu.VMEM((TM, N), jnp.float32)],
        compiler_params=pltpu.CompilerParams(
            dimension_semantics=("parallel", "arbitrary"),
            vmem_limit_bytes=_VMEM_LIMIT),
    )(x, w, scale2, bias2, *res2)


# ----------------------------------------------------------------------------- elementwise add kernel
def _ew_kernel(*refs, n_in, relu):
    acc = refs[0][...]
    for r in refs[1:n_in]:
        acc = acc + r[...]
    if relu:
        acc = jnp.maximum(acc, 0.0)
    refs[n_in][...] = acc


@partial(jax.jit, static_argnames=("relu",))
def ew(*arrs, relu=False):
    """Tiled elementwise sum (+ optional ReLU); only used for the two up+skip adds."""
    shape = arrs[0].shape
    n = arrs[0].size
    lane = 512 if n >= 8 * 512 else 128
    npad = _round_up(n, 8 * lane)
    rows = npad // lane
    tr = min(rows, 1024)
    flat = [jnp.pad(a.reshape(-1), (0, npad - n)).reshape(rows, lane) for a in arrs]
    out = pl.pallas_call(
        partial(_ew_kernel, n_in=len(arrs), relu=relu),
        out_shape=jax.ShapeDtypeStruct((rows, lane), jnp.float32),
        grid=(pl.cdiv(rows, tr),),
        in_specs=[pl.BlockSpec((tr, lane), lambda i: (i, 0)) for _ in arrs],
        out_specs=pl.BlockSpec((tr, lane), lambda i: (i, 0)),
        compiler_params=pltpu.CompilerParams(
            dimension_semantics=("parallel",), vmem_limit_bytes=_VMEM_LIMIT),
    )(*flat)
    return out.reshape(-1)[:n].reshape(shape)


# ----------------------------------------------------------------------------- conv glue
def _im2col_3d(x, ksize, stride=(1, 1, 1), dilation=(1, 1, 1), padding=(0, 0, 0),
               out_size=None):
    # x: (N, D, H, W, C)  channels-last
    Nb, D, H, W, C = x.shape
    kd, kh, kw = ksize
    sd, sh, sw = stride
    dd, dh, dw = dilation
    pd, ph, pw = padding
    if (out_size is None and ksize == (1, 1, 1) and stride == (1, 1, 1)
            and padding == (0, 0, 0)):
        return x.reshape(Nb * D * H * W, C), (Nb, D, H, W)   # pure reshape, no copy
    xp = jnp.pad(x, ((0, 0), (pd, pd), (ph, ph), (pw, pw), (0, 0))) if any(padding) else x
    if out_size is None:
        Do = (D + 2 * pd - dd * (kd - 1) - 1) // sd + 1
        Ho = (H + 2 * ph - dh * (kh - 1) - 1) // sh + 1
        Wo = (W + 2 * pw - dw * (kw - 1) - 1) // sw + 1
    else:
        Do, Ho, Wo = out_size
    cols = []
    for i in range(kd):
        for j in range(kh):
            for l in range(kw):
                cols.append(xp[:,
                               i * dd: i * dd + (Do - 1) * sd + 1: sd,
                               j * dh: j * dh + (Ho - 1) * sh + 1: sh,
                               l * dw: l * dw + (Wo - 1) * sw + 1: sw, :])
    patches = jnp.concatenate(cols, axis=-1) if len(cols) > 1 else cols[0]
    # TODO(synk): stream conv taps via per-tap in-kernel DMA (grid reduction axis) instead
    #             of materializing this patches matrix in HBM.
    return patches.reshape(Nb * Do * Ho * Wo, kd * kh * kw * C), (Nb, Do, Ho, Wo)


@partial(jax.jit, static_argnames=("ksize", "stride", "dilation", "padding",
                                   "relu", "dual", "res_after_act"))
def conv_fused(x, wmat, scale, bias, residuals=(), *, ksize,
               stride=(1, 1, 1), dilation=(1, 1, 1), padding=(0, 0, 0),
               relu=True, dual=False, res_after_act=False):
    """Conv3d + BN(eval) affine + fused residual adds + optional ReLU (single Pallas matmul)."""
    patches, (Nb, Do, Ho, Wo) = _im2col_3d(x, ksize, stride, dilation, padding)
    cout = wmat.shape[1]
    out = matmul_fused(patches, wmat, scale, bias, residuals,
                       relu=relu, dual=dual, res_after_act=res_after_act)
    if dual:
        return tuple(o.reshape(Nb, Do, Ho, Wo, cout) for o in out)
    return out.reshape(Nb, Do, Ho, Wo, cout)


# ConvTranspose3d(k=3, s=2, p=1, out_pad=1): output phase p along an axis uses these
# transpose-kernel tap indices (offset order matches im2col tap order).
_PHASE_TAPS = {0: [1], 1: [2, 0]}


@jax.jit
def convtranspose_fused(x, dparams):
    """ConvTranspose3d(k=3,s=2,p=1,op=1, bias) + BN(eval) + ReLU via 8 sub-pixel phase convs
    on the original (non-zero-inserted) input."""
    Nb, D, H, W, C = x.shape
    scale, bias = dparams["scale"], dparams["bias"]
    xp = jnp.pad(x, ((0, 0), (0, 1), (0, 1), (0, 1), (0, 0)))   # x[L] == 0 boundary taps
    phase_outs = []
    for pd in (0, 1):
        for ph in (0, 1):
            for pw in (0, 1):
                ksz = (1 + pd, 1 + ph, 1 + pw)
                if ksz == (1, 1, 1):
                    patches = x.reshape(Nb * D * H * W, C)
                else:
                    patches, _ = _im2col_3d(xp, ksz, out_size=(D, H, W))
                y = matmul_fused(patches, dparams["phases"][(pd, ph, pw)],
                                 scale, bias, relu=True)
                phase_outs.append(y)
    cout = phase_outs[0].shape[-1]
    stacked = jnp.stack(phase_outs, axis=0).reshape(2, 2, 2, Nb, D, H, W, cout)
    out = jnp.transpose(stacked, (3, 4, 0, 5, 1, 6, 2, 7))      # interleave phases
    return out.reshape(Nb, 2 * D, 2 * H, 2 * W, cout)


# ----------------------------------------------------------------------------- parameters
class ParamGen:
    def __init__(self, seed=0):
        self._key = jax.random.PRNGKey(seed)

    def _next(self):
        self._key, sub = jax.random.split(self._key)
        return sub

    def conv_w(self, cout, cin, k):
        fan_in = cin * k[0] * k[1] * k[2]
        return jax.random.normal(self._next(), (cout, cin) + tuple(k),
                                 jnp.float32) / np.sqrt(fan_in)

    def convT_w(self, cin, cout, k):
        fan_in = cin * k[0] * k[1] * k[2]
        return jax.random.normal(self._next(), (cin, cout) + tuple(k),
                                 jnp.float32) / np.sqrt(fan_in)

    def bias(self, c):
        return 0.01 * jax.random.normal(self._next(), (c,), jnp.float32)

    def bn(self, c):
        # eval-mode BatchNorm folded into (scale, bias); running_mean=0, running_var=1
        gamma = 1.0 + 0.1 * jax.random.normal(self._next(), (c,), jnp.float32)
        beta = 0.05 * jax.random.normal(self._next(), (c,), jnp.float32)
        return gamma / jnp.sqrt(1.0 + 1e-5), beta


def _conv_to_mat(w):
    # PyTorch (Cout,Cin,kd,kh,kw) -> matmul (K = kd*kh*kw*Cin, Cout), bf16 for the MXU.
    cout, cin, kd, kh, kw = w.shape
    return jnp.transpose(w, (2, 3, 4, 1, 0)).reshape(
        kd * kh * kw * cin, cout).astype(jnp.bfloat16)


def _fold_conv(pg, cout, cin, k):
    w = pg.conv_w(cout, cin, k)
    scale, bias = pg.bn(cout)
    return {"wmat": _conv_to_mat(w), "scale": scale, "bias": bias}


def _fold_pool_conv(pg, cout, cin, k):
    # AvgPool3d(kernel=k, stride=k) + Conv3d 1x1 + BN folded into one strided conv.
    w1 = pg.conv_w(cout, cin, (1, 1, 1))[:, :, 0, 0, 0]
    scale, bias = pg.bn(cout)
    kd, kh, kw = k
    wfull = jnp.broadcast_to(w1[:, :, None, None, None],
                             (cout, cin, kd, kh, kw)) / float(kd * kh * kw)
    return {"wmat": _conv_to_mat(wfull), "scale": scale, "bias": bias}


def _fold_deconv(pg, cin, cout):
    # ConvTranspose3d weight (Cin,Cout,3,3,3) + bias + BN, split into 8 phase conv matrices.
    w_t = pg.convT_w(cin, cout, (3, 3, 3))
    b = pg.bias(cout)
    scale, beta = pg.bn(cout)
    phases = {}
    for pd in (0, 1):
        for ph in (0, 1):
            for pw in (0, 1):
                sub = w_t[:, :, _PHASE_TAPS[pd], :, :]
                sub = sub[:, :, :, _PHASE_TAPS[ph], :]
                sub = sub[:, :, :, :, _PHASE_TAPS[pw]]
                wconv = jnp.transpose(sub, (1, 0, 2, 3, 4))   # (Cout,Cin,kd',kh',kw')
                phases[(pd, ph, pw)] = _conv_to_mat(wconv)
    return {"phases": phases, "scale": scale, "bias": beta + scale * b}


def make_bottleneck_params(pg, inplanes, planes, expansion, stride, dilation,
                           downsample_out=None):
    p = {
        "conv1": _fold_conv(pg, planes, inplanes, (1, 1, 1)),
        "conv2": _fold_conv(pg, planes, planes, (1, 1, 3)),
        "conv3": _fold_conv(pg, planes, planes, (1, 3, 1)),
        "conv4": _fold_conv(pg, planes, planes, (3, 1, 1)),
        "conv5": _fold_conv(pg, planes * expansion, planes, (1, 1, 1)),
    }
    if downsample_out is not None:
        p["ds"] = _fold_pool_conv(pg, downsample_out, inplanes, (2, 2, 2))
    if stride != 1:
        p["ds2"] = _fold_pool_conv(pg, planes, planes, (1, stride, 1))
        p["ds3"] = _fold_pool_conv(pg, planes, planes, (stride, 1, 1))
        p["ds4"] = _fold_pool_conv(pg, planes, planes, (stride, 1, 1))
    cfg = dict(stride=stride, dilation=tuple(dilation),
               has_ds=downsample_out is not None)
    return p, cfg


def build_params(feature, seed=0):
    pg = ParamGen(seed)
    F = feature
    P, CFG = {}, {}
    chans = [1, 3, 64, F]
    P["oper1"] = [_fold_conv(pg, chans[i + 1], chans[i], (3, 3, 3)) for i in range(3)]

    def make_layer(exp1, out1):
        blocks = [make_bottleneck_params(pg, F, F // 4, exp1, 2, (1, 1, 1),
                                         downsample_out=out1)]
        mid = out1
        for dil in ((1, 1, 1), (2, 2, 2), (3, 3, 3)):
            blocks.append(make_bottleneck_params(pg, mid, mid // 4, 4, 1, dil, None))
        return blocks

    for name, (exp1, out1) in (("layer1", (4, F)), ("layer2", (8, 2 * F)),
                               ("layer3", (4, F)), ("layer4", (8, 2 * F))):
        blocks = make_layer(exp1, out1)
        P[name] = [b[0] for b in blocks]
        CFG[name] = [b[1] for b in blocks]

    P["cls0"] = _fold_deconv(pg, 2 * F, F)
    P["cls1"] = _fold_deconv(pg, F, F)
    P["cls3"] = _fold_deconv(pg, 2 * F, F)
    P["cls4"] = _fold_deconv(pg, F, F)
    P["cls5"] = {"wmat": _conv_to_mat(pg.conv_w(2, F, (1, 1, 1))),
                 "scale": jnp.ones((2,), jnp.float32), "bias": pg.bias(2)}
    return P, CFG


# ----------------------------------------------------------------------------- model forward
def bottleneck_forward(x, p, cfg):
    s = cfg["stride"]
    d = cfg["dilation"]
    out1 = conv_fused(x, **p["conv1"], ksize=(1, 1, 1), relu=True)
    # conv2: dual output (pre-ReLU kept for residual / downsample branch)
    out2, out2_relu = conv_fused(out1, **p["conv2"], ksize=(1, 1, 3),
                                 stride=(1, 1, s), dilation=(1, 1, d[0]),
                                 padding=(0, 0, d[0]), dual=True)
    if s != 1:  # downsample2 = AvgPool(1,s,1)+1x1conv+BN folded into one strided conv
        out2 = conv_fused(out2, **p["ds2"], ksize=(1, s, 1), stride=(1, s, 1),
                          relu=False)
    # conv3 with out2 residual fused in the epilogue; dual output
    out3, out3_relu = conv_fused(out2_relu, **p["conv3"], residuals=(out2,),
                                 ksize=(1, 3, 1), stride=(1, s, 1),
                                 dilation=(1, d[1], 1), padding=(0, d[1], 0),
                                 dual=True)
    if s != 1:
        r2 = conv_fused(out2, **p["ds3"], ksize=(s, 1, 1), stride=(s, 1, 1),
                        relu=False)
        r3 = conv_fused(out3, **p["ds4"], ksize=(s, 1, 1), stride=(s, 1, 1),
                        relu=False)
    else:
        r2, r3 = out2, out3
    # conv4 with both residuals + ReLU fused
    out4_relu = conv_fused(out3_relu, **p["conv4"], residuals=(r2, r3),
                           ksize=(3, 1, 1), stride=(s, 1, 1),
                           dilation=(d[2], 1, 1), padding=(d[2], 0, 0), relu=True)
    residual = x
    if cfg["has_ds"]:   # AvgPool(2)+1x1conv+BN folded into one (2,2,2)-strided conv
        residual = conv_fused(x, **p["ds"], ksize=(2, 2, 2), stride=(2, 2, 2),
                              relu=False)
    # conv5 with skip residual + final ReLU fused
    return conv_fused(out4_relu, **p["conv5"], residuals=(residual,),
                      ksize=(1, 1, 1), relu=True)


def stage1_forward(params, cfgs, tsdf, depth_mapping_3d, feature_3d, sketch_gt=None):
    """tsdf: (N,1,D,H,W), feature_3d: (N,C,D,H,W)  (NCDHW). Returns (None, pred) in NCDHW."""
    del depth_mapping_3d, sketch_gt  # unused by the PyTorch forward as well
    x = jnp.transpose(tsdf, (0, 2, 3, 4, 1))           # -> NDHWC
    f3d = jnp.transpose(feature_3d, (0, 2, 3, 4, 1))

    # oper1 (3x3x3 conv+BN+ReLU x3); feature_3d add fused after the last ReLU
    x = conv_fused(x, **params["oper1"][0], ksize=(3, 3, 3), padding=(1, 1, 1))
    x = conv_fused(x, **params["oper1"][1], ksize=(3, 3, 3), padding=(1, 1, 1))
    x = conv_fused(x, **params["oper1"][2], ksize=(3, 3, 3), padding=(1, 1, 1),
                   residuals=(f3d,), res_after_act=True)

    c1 = x
    for p, cfg in zip(params["layer1"], cfgs["layer1"]):
        c1 = bottleneck_forward(c1, p, cfg)
    c2 = c1
    for p, cfg in zip(params["layer2"], cfgs["layer2"]):
        c2 = bottleneck_forward(c2, p, cfg)

    up1 = ew(convtranspose_fused(c2, params["cls0"]), c1)
    up2 = convtranspose_fused(up1, params["cls1"])      # pred_sketch_raw

    c3 = up2
    for p, cfg in zip(params["layer3"], cfgs["layer3"]):
        c3 = bottleneck_forward(c3, p, cfg)
    c4 = c3
    for p, cfg in zip(params["layer4"], cfgs["layer4"]):
        c4 = bottleneck_forward(c4, p, cfg)

    up3 = ew(convtranspose_fused(c4, params["cls3"]), c3)
    up4 = convtranspose_fused(up3, params["cls4"])

    # classify_sketch[5]: Dropout3d (eval -> identity) + Conv3d(F->2, k=1, bias=True)
    pred = conv_fused(up4, **params["cls5"], ksize=(1, 1, 1), relu=False)
    return None, jnp.transpose(pred, (0, 4, 1, 2, 3))   # -> NCDHW


# ----------------------------------------------------------------------------- main
if __name__ == "__main__":
    N, S, FEAT = 1, 8, 16  # small shapes: batch=1, 8^3 volume, feature=16
    key = jax.random.PRNGKey(0)
    k1, k2 = jax.random.split(key)
    tsdf = jax.random.normal(k1, (N, 1, S, S, S), jnp.float32)
    feature_3d = jax.random.normal(k2, (N, FEAT, S, S, S), jnp.float32)
    depth_mapping_3d = jnp.zeros((N, S * S * S), jnp.int32)  # unused by forward

    params, cfgs = build_params(feature=FEAT, seed=0)
    _, pred = stage1_forward(params, cfgs, tsdf, depth_mapping_3d, feature_3d)
    pred = jax.block_until_ready(pred)

    assert pred.shape == (N, 2, S, S, S), pred.shape
    assert bool(jnp.all(jnp.isfinite(pred)))
    print("KERNEL_OK")
</pallas_src>

<mosaic_0001>
module attributes {stable_mosaic.version = 11 : i64} {
  func.func @_mm_fused_kernel(%arg0: i32, %arg1: i32, %arg2: memref<256x27xf32, #tpu.memory_space<vmem>>, %arg3: memref<27x3xbf16, #tpu.memory_space<vmem>>, %arg4: memref<1x3xf32, #tpu.memory_space<vmem>>, %arg5: memref<1x3xf32, #tpu.memory_space<vmem>>, %arg6: memref<256x3xf32, #tpu.memory_space<vmem>>, %arg7: memref<256x3xf32, #tpu.memory_space<vmem>>) attributes {dimension_semantics = [#tpu.dimension_semantics<parallel>, #tpu.dimension_semantics<arbitrary>], iteration_bounds = array<i64: 2, 1>, scalar_prefetch = 0 : i64, scratch_operands = 1 : i64, tpu.core_type = #tpu.core_type<tc>, window_params = [{transform_indices = @transform_0, window_bounds = array<i64: 256, 27>}, {transform_indices = @transform_1, window_bounds = array<i64: 27, 3>}, {pipeline_mode = #tpu.pipeline_mode<synchronous>, transform_indices = @transform_2, window_bounds = array<i64: 1, 3>}, {pipeline_mode = #tpu.pipeline_mode<synchronous>, transform_indices = @transform_3, window_bounds = array<i64: 1, 3>}, {transform_indices = @transform_4, window_bounds = array<i64: 256, 3>}]} {
    %c0_i32 = arith.constant 0 : i32
    %0 = arith.cmpi eq, %arg1, %c0_i32 : i32
    %1 = arith.extui %0 : i1 to i32
    %c0_i32_0 = arith.constant 0 : i32
    %2 = arith.cmpi ne, %1, %c0_i32_0 : i32
    scf.if %2 {
      %cst_10 = arith.constant 0.000000e+00 : f32
      %13 = vector.broadcast %cst_10 : f32 to vector<256x3xf32>
      %c0_11 = arith.constant 0 : index
      %c0_12 = arith.constant 0 : index
      %14 = vector.load %arg7[%c0_11, %c0_12] : memref<256x3xf32, #tpu.memory_space<vmem>>, vector<256x3xf32>
      tpu.vector_store %arg7[%c0_11, %c0_12], %13 {strides = array<i32>} : memref<256x3xf32, #tpu.memory_space<vmem>>, vector<256x3xf32>,
    } else {
    }
    %c0 = arith.constant 0 : index
    %c0_1 = arith.constant 0 : index
    %3 = vector.load %arg7[%c0, %c0_1] : memref<256x3xf32, #tpu.memory_space<vmem>>, vector<256x3xf32>
    %c0_2 = arith.constant 0 : index
    %c0_3 = arith.constant 0 : index
    %4 = vector.load %arg2[%c0_2, %c0_3] : memref<256x27xf32, #tpu.memory_space<vmem>>, vector<256x27xf32>
    %5 = arith.truncf %4 : vector<256x27xf32> to vector<256x27xbf16>
    %c0_4 = arith.constant 0 : index
    %c0_5 = arith.constant 0 : index
    %6 = vector.load %arg3[%c0_4, %c0_5] : memref<27x3xbf16, #tpu.memory_space<vmem>>, vector<27x3xbf16>
    %cst = arith.constant dense<0.000000e+00> : vector<256x3xf32>
    %7 = tpu.matmul %5, %6, %cst {dimension_numbers = #tpu.dot_dimension_numbers<[1], [0], [0], [1], [0, 0, 1, 1], [], []>} : vector<256x27xbf16>, vector<27x3xbf16>, vector<256x3xf32> -> vector<256x3xf32>
    %8 = arith.addf %3, %7 : vector<256x3xf32>
    %c0_6 = arith.constant 0 : index
    %c0_7 = arith.constant 0 : index
    %9 = vector.load %arg7[%c0_6, %c0_7] : memref<256x3xf32, #tpu.memory_space<vmem>>, vector<256x3xf32>
    tpu.vector_store %arg7[%c0_6, %c0_7], %8 {strides = array<i32>} : memref<256x3xf32, #tpu.memory_space<vmem>>, vector<256x3xf32>,
    %c0_i32_8 = arith.constant 0 : i32
    %10 = arith.cmpi eq, %arg1, %c0_i32_8 : i32
    %11 = arith.extui %10 : i1 to i32
    %c0_i32_9 = arith.constant 0 : i32
    %12 = arith.cmpi ne, %11, %c0_i32_9 : i32
    scf.if %12 {
      %c0_10 = arith.constant 0 : index
      %c0_11 = arith.constant 0 : index
      %13 = vector.load %arg7[%c0_10, %c0_11] : memref<256x3xf32, #tpu.memory_space<vmem>>, vector<256x3xf32>
      %c0_12 = arith.constant 0 : index
      %c0_13 = arith.constant 0 : index
      %14 = vector.load %arg4[%c0_12, %c0_13] : memref<1x3xf32, #tpu.memory_space<vmem>>, vector<1x3xf32>
      %15 = vector.broadcast %14 : vector<1x3xf32> to vector<256x3xf32>
      %16 = arith.mulf %13, %15 : vector<256x3xf32>
      %c0_14 = arith.constant 0 : index
      %c0_15 = arith.constant 0 : index
      %17 = vector.load %arg5[%c0_14, %c0_15] : memref<1x3xf32, #tpu.memory_space<vmem>>, vector<1x3xf32>
      %18 = vector.broadcast %17 : vector<1x3xf32> to vector<256x3xf32>
      %19 = arith.addf %16, %18 : vector<256x3xf32>
      %cst_16 = arith.constant 0.000000e+00 : f32
      %20 = vector.broadcast %cst_16 : f32 to vector<256x3xf32>
      %21 = arith.maximumf %19, %20 : vector<256x3xf32>
      %c0_17 = arith.constant 0 : index
      %c0_18 = arith.constant 0 : index
      %22 = vector.load %arg6[%c0_17, %c0_18] : memref<256x3xf32, #tpu.memory_space<vmem>>, vector<256x3xf32>
      tpu.vector_store %arg6[%c0_17, %c0_18], %21 {strides = array<i32>} : memref<256x3xf32, #tpu.memory_space<vmem>>, vector<256x3xf32>,
    } else {
    }
    return
  }
  func.func @transform_0(%arg0: i32, %arg1: i32) -> (i32, i32) {
    %c0_i32 = arith.constant 0 : i32
    return %arg0, %arg1 : i32, i32
  }
  func.func @transform_1(%arg0: i32, %arg1: i32) -> (i32, i32) {
    %c0_i32 = arith.constant 0 : i32
    %c0_i32_0 = arith.constant 0 : i32
    return %arg1, %c0_i32 : i32, i32
  }
  func.func @transform_2(%arg0: i32, %arg1: i32) -> (i32, i32) {
    %c0_i32 = arith.constant 0 : i32
    %c0_i32_0 = arith.constant 0 : i32
    %c0_i32_1 = arith.constant 0 : i32
    return %c0_i32, %c0_i32_0 : i32, i32
  }
  func.func @transform_3(%arg0: i32, %arg1: i32) -> (i32, i32) {
    %c0_i32 = arith.constant 0 : i32
    %c0_i32_0 = arith.constant 0 : i32
    %c0_i32_1 = arith.constant 0 : i32
    return %c0_i32, %c0_i32_0 : i32, i32
  }
  func.func @transform_4(%arg0: i32, %arg1: i32) -> (i32, i32) {
    %c0_i32 = arith.constant 0 : i32
    %c0_i32_0 = arith.constant 0 : i32
    return %arg0, %c0_i32 : i32, i32
  }
}

</mosaic_0001>

<bundles_post_ra>
// kernel: conv_fused.1
= control target key start
LH: loop header
LB: loop body
LE: loop exit
PB: predicated region body
PF: predicated region fallthrough
CT: control target
= control target key end

     0   :  { %s1090_s15 = smov 0   ;;  %s1092_s16 = smov 0   ;;  %s1403_s0 = inlined_call_operand.vmem [shape: f32[512,27], index: 0, kind: input, shape index: {}]   ;;  %s1404_s1 = inlined_call_operand.vmem [shape: bf16[27,3], index: 1, kind: input, shape index: {}]   ;;  %s1405_s2 = inlined_call_operand.vmem [shape: f32[1,3], index: 2, kind: input, shape index: {}]   ;;  %s1406_s3 = inlined_call_operand.vmem [shape: f32[1,3], index: 3, kind: input, shape index: {}]   ;;  %s1407_s4 = inlined_call_operand.vmem [shape: f32[512,3], index: 4, kind: output, shape index: {}]  }
   0x1   :  { %s1094_s17 = smov 0  }
   0x2 LB: > { %s26_s18 = sadd.s32 1, %s1057_s16  ;;  %p926_p0 = scmp.ge.s32.totalorder %s1061_s17, 1  ;;  %s1061_s17 = sphi %s1094_s17, %s14_s17   ;;  %s1057_s16 = sphi %s1092_s16, %s1410_s16   ;;  %s1053_s15 = sphi %s1090_s15, %s1409_s15  }
   0x3   : > { %p28_p1 = scmp.ge.s32.totalorder %s26_s18, 2  ;;  %p191_p2 = scmp.lt.s32.totalorder %s1061_s17, 3 }
   0x5   : > { %s1412_s18 = smov (%p28_p1, %s26_s18), 0  ;;  %p192_p3 = pnand %p926_p0, %p191_p2 }
   0x6   : > { %v1037_v0 = vld [vmem:[%s1404_s1] sm:$0xff] (!%p192_p3)   ;;  %vm428_vm0 = vcmask (!%p192_p3), 1044480   ;;  %v1038_v1 = vld [vmem:[%s1404_s1 + $0x8] sm:$0x3f] (!%p192_p3)   ;;  %vm429_vm1 = vcmask (!%p192_p3), 1045504   ;;  %s927_s23 = sshll.u32 (!%p192_p3), %s1053_s15, 5 }
   0x7   : > { %195 = sbr.rel (%p192_p3) target bundleno = 282 (0x11a), region = 36  ;;  %971 = vmatprep.subr.bf16.mxu0 (!%p192_p3), %v1037_v0  ;;  %1007 = vmatprep.subr.bf16.mxu1 (!%p192_p3), %v1037_v0  ;;  %vm251_vm2 = vcmask (!%p192_p3), 23552   ;;  %v1063_v2 = vmov (!%p192_p3), 65535   ;;  %p1119_p4 = scmp.lt.s32.totalorder (!%p192_p3), %s927_s23, 63  ;;  %v1064_v5 = vmov (!%p192_p3), 0.0   ;;  %vm379_vm3 = vcmask (!%p192_p3), 220160  }
   0x8   : > { %972 = vmatpush3.bf16.msra.mxu0 (!%p192_p3), %v1037_v0  ;;  %1009 = vmatpush3.bf16.msra.mxu1 (!%p192_p3), %v1037_v0  ;;  %v430_v3 = vsel (!%p192_p3), %vm428_vm0, 4294967295, %v1063_v2  ;;  %254 = vst.msk [vmem:[#allocation2 + $0x10] sm:$0xff] (!%p192_p3), %vm251_vm2, %v1064_v5  ;;  %252 = vst.msk [vmem:[#allocation2] sm:$0xff] (!%p192_p3), %vm251_vm2, %v1064_v5 }
   0x9   : > { %v431_v4 = vsel (!%p192_p3), %vm429_vm1, %v430_v3, 0  ;;  %253 = vst.msk [vmem:[#allocation2 + $0x8] sm:$0xff] (!%p192_p3), %vm251_vm2, %v1064_v5  ;;  %255 = vst.msk [vmem:[#allocation2 + $0x18] sm:$0xff] (!%p192_p3), %vm251_vm2, %v1064_v5 }
   0xa   : > { %256 = vst.msk [vmem:[#allocation2 + $0x20] sm:$0xff] (!%p192_p3), %vm251_vm2, %v1064_v5  ;;  %257 = vst.msk [vmem:[#allocation2 + $0x28] sm:$0xff] (!%p192_p3), %vm251_vm2, %v1064_v5  ;;  %v433_v6 = vand.u32 (!%p192_p3), %v1038_v1, %v431_v4 }
   0xb   : > { %258 = vst.msk [vmem:[#allocation2 + $0x30] sm:$0xff] (!%p192_p3), %vm251_vm2, %v1064_v5  ;;  %259 = vst.msk [vmem:[#allocation2 + $0x38] sm:$0xff] (!%p192_p3), %vm251_vm2, %v1064_v5 }
   0xc   : > { %260 = vst.msk [vmem:[#allocation2 + $0x40] sm:$0xff] (!%p192_p3), %vm251_vm2, %v1064_v5  ;;  %261 = vst.msk [vmem:[#allocation2 + $0x48] sm:$0xff] (!%p192_p3), %vm251_vm2, %v1064_v5  ;;  %973 = vmatprep.subr.bf16.mxu0 (!%p192_p3), %v433_v6  ;;  %1008 = vmatprep.subr.bf16.mxu1 (!%p192_p3), %v433_v6 }
   0xd   : > { %262 = vst.msk [vmem:[#allocation2 + $0x50] sm:$0xff] (!%p192_p3), %vm251_vm2, %v1064_v5  ;;  %263 = vst.msk [vmem:[#allocation2 + $0x58] sm:$0xff] (!%p192_p3), %vm251_vm2, %v1064_v5  ;;  %974 = vmatpush3.bf16.msra.mxu0 (!%p192_p3), %v433_v6  ;;  %1010 = vmatpush3.bf16.msra.mxu1 (!%p192_p3), %v433_v6 }
   0xe   : > { %264 = vst.msk [vmem:[#allocation2 + $0x60] sm:$0xff] %vm251_vm2, %v1064_v5  ;;  %265 = vst.msk [vmem:[#allocation2 + $0x68] sm:$0xff] %vm251_vm2, %v1064_v5  ;;  %s1414_s23 = smov (!%p1119_p4, %s927_s23), 63 }
   0xf   : > { %266 = vst.msk [vmem:[#allocation2 + $0x70] sm:$0xff] %vm251_vm2, %v1064_v5  ;;  %267 = vst.msk [vmem:[#allocation2 + $0x78] sm:$0xff] %vm251_vm2, %v1064_v5  ;;  %s928_s25 = sshll.u32 %s1414_s23, 3  ;;  %v286_v55 = vld [vmem:[#allocation2 + $0x10] sm:$0xff]  ;;  %v284_v57 = vld [vmem:[#allocation2] sm:$0xff] }
  0x10   : > { %268 = vst.msk [vmem:[#allocation2 + $0x80] sm:$0xff] %vm251_vm2, %v1064_v5  ;;  %269 = vst.msk [vmem:[#allocation2 + $0x88] sm:$0xff] %vm251_vm2, %v1064_v5  ;;  %s1167_s28 = scalar_lea.vmem %s1403_s0, %s928_s25  ;;  %v287_v60 = vld [vmem:[#allocation2 + $0x18] sm:$0xff]  ;;  %v285_v1 = vld [vmem:[#allocation2 + $0x8] sm:$0xff]  ;;  %s1251_s9 = scalar_lea.vmem %s1407_s4, %s928_s25 }
  0x11   : > { %270 = vst.msk [vmem:[#allocation2 + $0x90] sm:$0xff] %vm251_vm2, %v1064_v5  ;;  %271 = vst.msk [vmem:[#allocation2 + $0x98] sm:$0xff] %vm251_vm2, %v1064_v5  ;;  %v316_v7 = vld [vmem:[%s1167_s28] sm:$0xff]  ;;  %v317_v8 = vld [vmem:[%s1167_s28 + $0x8] sm:$0xff] }
  0x12   : > { %272 = vst.msk [vmem:[#allocation2 + $0xa0] sm:$0xff] %vm251_vm2, %v1064_v5  ;;  %273 = vst.msk [vmem:[#allocation2 + $0xa8] sm:$0xff] %vm251_vm2, %v1064_v5  ;;  %v332_v9 = vld [vmem:[%s1167_s28 + $0x80] sm:$0xff]  ;;  %v348_v10 = vpack.c.bf16 %v317_v8, %v316_v7  ;;  %v333_v11 = vld [vmem:[%s1167_s28 + $0x88] sm:$0xff] }
  0x13   : > { %274 = vst.msk [vmem:[#allocation2 + $0xb0] sm:$0xff] %vm251_vm2, %v1064_v5  ;;  %275 = vst.msk [vmem:[#allocation2 + $0xb8] sm:$0xff] %vm251_vm2, %v1064_v5  ;;  %v318_v12 = vld [vmem:[%s1167_s28 + $0x10] sm:$0xff]  ;;  %v319_v13 = vld [vmem:[%s1167_s28 + $0x18] sm:$0xff]  ;;  %v356_v14 = vpack.c.bf16 %v333_v11, %v332_v9 }
  0x14   : > { %276 = vst.msk [vmem:[#allocation2 + $0xc0] sm:$0xff] %vm251_vm2, %v1064_v5  ;;  %277 = vst.msk [vmem:[#allocation2 + $0xc8] sm:$0xff] %vm251_vm2, %v1064_v5  ;;  %v349_v15 = vpack.c.bf16 %v319_v13, %v318_v12  ;;  %v334_v16 = vld [vmem:[%s1167_s28 + $0x90] sm:$0xff]  ;;  %v335_v17 = vld [vmem:[%s1167_s28 + $0x98] sm:$0xff]  ;;  %975 = vmatprep.mubr.msk.bf16.mxu0 %vm379_vm3, %v348_v10 }
  0x15   : > { %278 = vst.msk [vmem:[#allocation2 + $0xd0] sm:$0xff] %vm251_vm2, %v1064_v5  ;;  %279 = vst.msk [vmem:[#allocation2 + $0xd8] sm:$0xff] %vm251_vm2, %v1064_v5  ;;  %v320_v18 = vld [vmem:[%s1167_s28 + $0x20] sm:$0xff]  ;;  %v357_v19 = vpack.c.bf16 %v335_v17, %v334_v16  ;;  %v321_v20 = vld [vmem:[%s1167_s28 + $0x28] sm:$0xff]  ;;  %991 = vmatprep.mubr.msk.bf16.mxu1 %vm379_vm3, %v356_v14 }
  0x16   : > { %280 = vst.msk [vmem:[#allocation2 + $0xe0] sm:$0xff] %vm251_vm2, %v1064_v5  ;;  %281 = vst.msk [vmem:[#allocation2 + $0xe8] sm:$0xff] %vm251_vm2, %v1064_v5  ;;  %v336_v21 = vld [vmem:[%s1167_s28 + $0xa0] sm:$0xff]  ;;  %v337_v22 = vld [vmem:[%s1167_s28 + $0xa8] sm:$0xff]  ;;  %976 = vmatmul.mubr.msk.bf16.vlgmr.msra.gmra.mrb[0].mxu0 %vm379_vm3, %v349_v15  ;;  %v350_v23 = vpack.c.bf16 %v321_v20, %v320_v18 }
  0x17   : > { %282 = vst.msk [vmem:[#allocation2 + $0xf0] sm:$0xff] %vm251_vm2, %v1064_v5  ;;  %283 = vst.msk [vmem:[#allocation2 + $0xf8] sm:$0xff] %vm251_vm2, %v1064_v5  ;;  %v358_v24 = vpack.c.bf16 %v337_v22, %v336_v21  ;;  %992 = vmatmul.mubr.msk.bf16.vlgmr.msra.gmra.mrb[0].mxu1 %vm379_vm3, %v357_v19  ;;  %v322_v25 = vld [vmem:[%s1167_s28 + $0x30] sm:$0xff]  ;;  %v323_v26 = vld [vmem:[%s1167_s28 + $0x38] sm:$0xff] }
  0x18   : > { %v338_v27 = vld [vmem:[%s1167_s28 + $0xb0] sm:$0xff]  ;;  %979 = vmatprep.mubr.msk.bf16.mxu0 %vm379_vm3, %v350_v23  ;;  %v339_v28 = vld [vmem:[%s1167_s28 + $0xb8] sm:$0xff]  ;;  %v324_v29 = vld [vmem:[%s1167_s28 + $0x40] sm:$0xff]  ;;  %v351_v33 = vpack.c.bf16 %v323_v26, %v322_v25 }
  0x19   : > { %995 = vmatprep.mubr.msk.bf16.mxu1 %vm379_vm3, %v358_v24  ;;  %v325_v30 = vld [vmem:[%s1167_s28 + $0x48] sm:$0xff]  ;;  %v340_v31 = vld [vmem:[%s1167_s28 + $0xc0] sm:$0xff]  ;;  %v359_v34 = vpack.c.bf16 %v339_v28, %v338_v27  ;;  %v326_v37 = vld [vmem:[%s1167_s28 + $0x50] sm:$0xff] }
  0x1a   : > { %v341_v32 = vld [vmem:[%s1167_s28 + $0xc8] sm:$0xff]  ;;  %v352_v35 = vpack.c.bf16 %v325_v30, %v324_v29  ;;  %v327_v38 = vld [vmem:[%s1167_s28 + $0x58] sm:$0xff]  ;;  %v342_v39 = vld [vmem:[%s1167_s28 + $0xd0] sm:$0xff] }
  0x1b   : > { %v360_v36 = vpack.c.bf16 %v341_v32, %v340_v31  ;;  %v343_v40 = vld [vmem:[%s1167_s28 + $0xd8] sm:$0xff]  ;;  %v328_v41 = vld [vmem:[%s1167_s28 + $0x60] sm:$0xff]  ;;  %v329_v42 = vld [vmem:[%s1167_s28 + $0x68] sm:$0xff]  ;;  %v353_v45 = vpack.c.bf16 %v327_v38, %v326_v37 }
  0x1c   : > { %v344_v43 = vld [vmem:[%s1167_s28 + $0xe0] sm:$0xff]  ;;  %v345_v44 = vld [vmem:[%s1167_s28 + $0xe8] sm:$0xff]  ;;  %v361_v46 = vpack.c.bf16 %v343_v40, %v342_v39  ;;  %v354_v47 = vpack.c.bf16 %v329_v42, %v328_v41  ;;  %v330_v49 = vld [vmem:[%s1167_s28 + $0x70] sm:$0xff] }
  0x1d   : > { %v362_v48 = vpack.c.bf16 %v345_v44, %v344_v43  ;;  %v331_v50 = vld [vmem:[%s1167_s28 + $0x78] sm:$0xff]  ;;  %v346_v51 = vld [vmem:[%s1167_s28 + $0xf0] sm:$0xff]  ;;  %v300_v59 = vld [vmem:[#allocation2 + $0x80] sm:$0xff] }
  0x1e   : > { %980 = vmatmul.mubr.msk.bf16.gmra.mrb[4].mxu0 %vm379_vm3, %v351_v33  ;;  %v347_v52 = vld [vmem:[%s1167_s28 + $0xf8] sm:$0xff]  ;;  %v355_v53 = vpack.c.bf16 %v331_v50, %v330_v49  ;;  %v302_v56 = vld [vmem:[#allocation2 + $0x90] sm:$0xff]  ;;  %v301_v6 = vld [vmem:[#allocation2 + $0x88] sm:$0xff] }
  0x1f   : > { %996 = vmatmul.mubr.msk.bf16.gmra.mrb[4].mxu1 %vm379_vm3, %v359_v34  ;;  %983 = vmatprep.mubr.msk.bf16.mxu0 %vm379_vm3, %v352_v35  ;;  %v363_v54 = vpack.c.bf16 %v347_v52, %v346_v51  ;;  %v303_v0 = vld [vmem:[#allocation2 + $0x98] sm:$0xff]  ;;  %v290_v15 = vld [vmem:[#allocation2 + $0x30] sm:$0xff]  ;;  %v288_v17 = vld [vmem:[#allocation2 + $0x20] sm:$0xff] }
  0x20   : > { %999 = vmatprep.mubr.msk.bf16.mxu1 %vm379_vm3, %v360_v36  ;;  %v306_v16 = vld [vmem:[#allocation2 + $0xb0] sm:$0xff]  ;;  %v1228_v18 = vld [vmem:[%s1405_s2] ss:$0 sm:$0xff]  ;;  %v291_v21 = vld [vmem:[#allocation2 + $0x38] sm:$0xff] }
  0x21   : > { %v304_v20 = vld [vmem:[#allocation2 + $0xa0] sm:$0xff]  ;;  %v307_v25 = vld [vmem:[#allocation2 + $0xb8] sm:$0xff]  ;;  %v289_v26 = vld [vmem:[#allocation2 + $0x28] sm:$0xff] }
  0x22   : > { %v1233_v28 = vld [vmem:[%s1406_s3] ss:$0 sm:$0xff]  ;;  %v305_v33 = vld [vmem:[#allocation2 + $0xa8] sm:$0xff] }
  0x26   : > { %984 = vmatmul.mubr.msk.bf16.gmra.mrb[8].mxu0 %vm379_vm3, %v353_v45 }
  0x27   : > { %1000 = vmatmul.mubr.msk.bf16.gmra.mrb[8].mxu1 %vm379_vm3, %v361_v46  ;;  %987 = vmatprep.mubr.msk.bf16.mxu0 %vm379_vm3, %v354_v47 }
  0x28   : > { %1003 = vmatprep.mubr.msk.bf16.mxu1 %vm379_vm3, %v362_v48 }
  0x2e   : > { %988 = vmatmul.mubr.msk.bf16.gmra.mrb[12].mxu0 %vm379_vm3, %v355_v53 }
  0x2f   : > { %1004 = vmatmul.mubr.msk.bf16.gmra.mrb[12].mxu1 %vm379_vm3, %v363_v54 }
  0xe9   : > { %v977_v58 = vpop.f32.mrb[0].mxu0 }
  0xea   : > { %v598_v61 = vadd.f32 %v977_v58, %v286_v55  ;;  %v993_v62 = vpop.f32.mrb[0].mxu1  ;;  %v469_v63 = vpop.f32.mrb[1].mxu0 }
  0xeb   : > { %v614_v2 = vadd.f32 %v993_v62, %v302_v56  ;;  %v596_v3 = vadd.f32 %v469_v63, %v284_v57  ;;  %v533_v4 = vpop.f32.mrb[1].mxu1  ;;  %v978_v5 = vpop.f32.mrb[2].mxu0 }
  0xec   : > { %631 = vst.msk [vmem:[#allocation2 + $0x10] sm:$0xff] %vm251_vm2, %v598_v61  ;;  %v612_v7 = vadd.f32 %v533_v4, %v300_v59  ;;  %v599_v8 = vadd.f32 %v978_v5, %v287_v60  ;;  %v994_v9 = vpop.f32.mrb[2].mxu1  ;;  %v472_v10 = vpop.f32.mrb[3].mxu0  ;;  %v294_v59 = vld [vmem:[#allocation2 + $0x50] sm:$0xff] }
  0xed   : > { %647 = vst.msk [vmem:[#allocation2 + $0x90] sm:$0xff] %vm251_vm2, %v614_v2  ;;  %629 = vst.msk [vmem:[#allocation2] sm:$0xff] %vm251_vm2, %v596_v3  ;;  %v615_v11 = vadd.f32 %v994_v9, %v303_v0  ;;  %v597_v12 = vadd.f32 %v472_v10, %v285_v1  ;;  %v536_v13 = vpop.f32.mrb[3].mxu1  ;;  %v310_v0 = vld [vmem:[#allocation2 + $0xd0] sm:$0xff]  ;;  %v292_v1 = vld [vmem:[#allocation2 + $0x40] sm:$0xff] }
  0xee   : > { %645 = vst.msk [vmem:[#allocation2 + $0x80] sm:$0xff] %vm251_vm2, %v612_v7  ;;  %632 = vst.msk [vmem:[#allocation2 + $0x18] sm:$0xff] %vm251_vm2, %v599_v8  ;;  %v613_v14 = vadd.f32 %v536_v13, %v301_v6  ;;  %v308_v7 = vld [vmem:[#allocation2 + $0xc0] sm:$0xff]  ;;  %v295_v8 = vld [vmem:[#allocation2 + $0x58] sm:$0xff] }
  0xef   : > { %648 = vst.msk [vmem:[#allocation2 + $0x98] sm:$0xff] %vm251_vm2, %v615_v11  ;;  %630 = vst.msk [vmem:[#allocation2 + $0x8] sm:$0xff] %vm251_vm2, %v597_v12 }
  0xf0   : > { %646 = vst.msk [vmem:[#allocation2 + $0x88] sm:$0xff] %vm251_vm2, %v613_v14 }
  0xf1   : > { %v981_v19 = vpop.f32.mrb[4].mxu0 }
  0xf2   : > { %v602_v22 = vadd.f32 %v981_v19, %v290_v15  ;;  %v997_v23 = vpop.f32.mrb[4].mxu1  ;;  %v485_v24 = vpop.f32.mrb[5].mxu0  ;;  %v311_v15 = vld [vmem:[#allocation2 + $0xd8] sm:$0xff] }
  0xf3   : > { %v666_v27 = vld [vmem:[#allocation2 + $0x10] sm:$0xff]  ;;  %v618_v29 = vadd.f32 %v997_v23, %v306_v16  ;;  %v600_v30 = vadd.f32 %v485_v24, %v288_v17  ;;  %v549_v31 = vpop.f32.mrb[5].mxu1  ;;  %v982_v32 = vpop.f32.mrb[6].mxu0  ;;  %v293_v16 = vld [vmem:[#allocation2 + $0x48] sm:$0xff] }
  0xf4   : > { %v705_v34 = vmul.f32 %v1228_v18, %v666_v27  ;;  %v682_v35 = vld [vmem:[#allocation2 + $0x90] sm:$0xff]  ;;  %v664_v36 = vld [vmem:[#allocation2] sm:$0xff]  ;;  %635 = vst.msk [vmem:[#allocation2 + $0x30] sm:$0xff] %vm251_vm2, %v602_v22  ;;  %v616_v37 = vadd.f32 %v549_v31, %v304_v20  ;;  %v603_v38 = vadd.f32 %v982_v32, %v291_v21  ;;  %v998_v39 = vpop.f32.mrb[6].mxu1  ;;  %v488_v40 = vpop.f32.mrb[7].mxu0 }
  0xf5   : > { %v721_v41 = vmul.f32 %v1228_v18, %v682_v35  ;;  %v703_v42 = vmul.f32 %v1228_v18, %v664_v36  ;;  %v680_v43 = vld [vmem:[#allocation2 + $0x80] sm:$0xff]  ;;  %v667_v44 = vld [vmem:[#allocation2 + $0x18] sm:$0xff]  ;;  %651 = vst.msk [vmem:[#allocation2 + $0xb0] sm:$0xff] %vm251_vm2, %v618_v29  ;;  %633 = vst.msk [vmem:[#allocation2 + $0x20] sm:$0xff] %vm251_vm2, %v600_v30  ;;  %v619_v45 = vadd.f32 %v998_v39, %v307_v25  ;;  %v552_v47 = vpop.f32.mrb[7].mxu1 }
  0xf6   : > { %v601_v46 = vadd.f32 %v488_v40, %v289_v26  ;;  %v744_v48 = vadd.f32 %v1233_v28, %v705_v34  ;;  %v719_v49 = vmul.f32 %v1228_v18, %v680_v43  ;;  %v706_v50 = vmul.f32 %v1228_v18, %v667_v44  ;;  %v683_v51 = vld [vmem:[#allocation2 + $0x98] sm:$0xff]  ;;  %v665_v52 = vld [vmem:[#allocation2 + $0x8] sm:$0xff]  ;;  %649 = vst.msk [vmem:[#allocation2 + $0xa0] sm:$0xff] %vm251_vm2, %v616_v37 }
  0xf7   : > { %636 = vst.msk [vmem:[#allocation2 + $0x38] sm:$0xff] %vm251_vm2, %v603_v38  ;;  %v617_v53 = vadd.f32 %v552_v47, %v305_v33  ;;  %v760_v54 = vadd.f32 %v1233_v28, %v721_v41  ;;  %v742_v55 = vadd.f32 %v1233_v28, %v703_v42  ;;  %v722_v56 = vmul.f32 %v1228_v18, %v683_v51  ;;  %v681_v58 = vld [vmem:[#allocation2 + $0x88] sm:$0xff] }
  0xf8   : > { %v704_v57 = vmul.f32 %v1228_v18, %v665_v52  ;;  %652 = vst.msk [vmem:[#allocation2 + $0xb8] sm:$0xff] %vm251_vm2, %v619_v45  ;;  %634 = vst.msk [vmem:[#allocation2 + $0x28] sm:$0xff] %vm251_vm2, %v601_v46  ;;  %v776_v60 = vmax.f32 %v744_v48, 0.0  ;;  %v758_v61 = vadd.f32 %v1233_v28, %v719_v49  ;;  %v745_v62 = vadd.f32 %v1233_v28, %v706_v50  ;;  %v309_v25 = vld [vmem:[#allocation2 + $0xc8] sm:$0xff] }
  0xf9   : > { %v720_v63 = vmul.f32 %v1228_v18, %v681_v58  ;;  %650 = vst.msk [vmem:[#allocation2 + $0xa8] sm:$0xff] %vm251_vm2, %v617_v53  ;;  %v792_v2 = vmax.f32 %v760_v54, 0.0  ;;  %v774_v3 = vmax.f32 %v742_v55, 0.0  ;;  %v761_v4 = vadd.f32 %v1233_v28, %v722_v56  ;;  %v985_v6 = vpop.f32.mrb[8].mxu0  ;;  %v298_v53 = vld [vmem:[#allocation2 + $0x70] sm:$0xff] }
  0xfa   : > { %v743_v5 = vadd.f32 %v1233_v28, %v704_v57  ;;  %808 = vst.msk [vmem:[%s1251_s9 + $0x10] sm:$0xff] %vm251_vm2, %v776_v60  ;;  %v790_v9 = vmax.f32 %v758_v61, 0.0  ;;  %v777_v10 = vmax.f32 %v745_v62, 0.0  ;;  %v606_v12 = vadd.f32 %v985_v6, %v294_v59  ;;  %v1001_v13 = vpop.f32.mrb[8].mxu1  ;;  %v501_v14 = vpop.f32.mrb[9].mxu0  ;;  %v314_v58 = vld [vmem:[#allocation2 + $0xf0] sm:$0xff] }
  0xfb   : > { %v759_v11 = vadd.f32 %v1233_v28, %v720_v63  ;;  %824 = vst.msk [vmem:[%s1251_s9 + $0x90] sm:$0xff] %vm251_vm2, %v792_v2  ;;  %806 = vst.msk [vmem:[%s1251_s9] sm:$0xff] %vm251_vm2, %v774_v3  ;;  %v793_v17 = vmax.f32 %v761_v4, 0.0  ;;  %v670_v20 = vld [vmem:[#allocation2 + $0x30] sm:$0xff]  ;;  %v622_v21 = vadd.f32 %v1001_v13, %v310_v0  ;;  %v604_v22 = vadd.f32 %v501_v14, %v292_v1  ;;  %v565_v23 = vpop.f32.mrb[9].mxu1  ;;  %v986_v24 = vpop.f32.mrb[10].mxu0 }
  0xfc   : > { %v775_v19 = vmax.f32 %v743_v5, 0.0  ;;  %822 = vst.msk [vmem:[%s1251_s9 + $0x80] sm:$0xff] %vm251_vm2, %v790_v9  ;;  %809 = vst.msk [vmem:[%s1251_s9 + $0x18] sm:$0xff] %vm251_vm2, %v777_v10  ;;  %v709_v27 = vmul.f32 %v1228_v18, %v670_v20  ;;  %v686_v29 = vld [vmem:[#allocation2 + $0xb0] sm:$0xff]  ;;  %v668_v30 = vld [vmem:[#allocation2 + $0x20] sm:$0xff]  ;;  %v620_v31 = vadd.f32 %v565_v23, %v308_v7  ;;  %v607_v32 = vadd.f32 %v986_v24, %v295_v8  ;;  %v1002_v33 = vpop.f32.mrb[10].mxu1 }
  0xfd   : > { %v791_v26 = vmax.f32 %v759_v11, 0.0  ;;  %639 = vst.msk [vmem:[#allocation2 + $0x50] sm:$0xff] %vm251_vm2, %v606_v12  ;;  %v504_v34 = vpop.f32.mrb[11].mxu0  ;;  %825 = vst.msk [vmem:[%s1251_s9 + $0x98] sm:$0xff] %vm251_vm2, %v793_v17  ;;  %v725_v35 = vmul.f32 %v1228_v18, %v686_v29  ;;  %v707_v36 = vmul.f32 %v1228_v18, %v668_v30  ;;  %v684_v37 = vld [vmem:[#allocation2 + $0xa0] sm:$0xff]  ;;  %v623_v39 = vadd.f32 %v1002_v33, %v311_v15  ;;  %v568_v41 = vpop.f32.mrb[11].mxu1 }
  0xfe   : > { %807 = vst.msk [vmem:[%s1251_s9 + $0x8] sm:$0xff] %vm251_vm2, %v775_v19  ;;  %v671_v38 = vld [vmem:[#allocation2 + $0x38] sm:$0xff]  ;;  %655 = vst.msk [vmem:[#allocation2 + $0xd0] sm:$0xff] %vm251_vm2, %v622_v21  ;;  %v605_v40 = vadd.f32 %v504_v34, %v293_v16  ;;  %v748_v42 = vadd.f32 %v1233_v28, %v709_v27  ;;  %v723_v43 = vmul.f32 %v1228_v18, %v684_v37  ;;  %v296_v59 = vld [vmem:[#allocation2 + $0x60] sm:$0xff] }
  0xff   : > { %637 = vst.msk [vmem:[#allocation2 + $0x40] sm:$0xff] %vm251_vm2, %v604_v22  ;;  %823 = vst.msk [vmem:[%s1251_s9 + $0x88] sm:$0xff] %vm251_vm2, %v791_v26  ;;  %v710_v44 = vmul.f32 %v1228_v18, %v671_v38  ;;  %v687_v45 = vld [vmem:[#allocation2 + $0xb8] sm:$0xff]  ;;  %v669_v46 = vld [vmem:[#allocation2 + $0x28] sm:$0xff]  ;;  %v621_v47 = vadd.f32 %v568_v41, %v309_v25  ;;  %v764_v48 = vadd.f32 %v1233_v28, %v725_v35 }
 0x100   : > { %653 = vst.msk [vmem:[#allocation2 + $0xc0] sm:$0xff] %vm251_vm2, %v620_v31  ;;  %640 = vst.msk [vmem:[#allocation2 + $0x58] sm:$0xff] %vm251_vm2, %v607_v32  ;;  %v746_v49 = vadd.f32 %v1233_v28, %v707_v36  ;;  %v726_v50 = vmul.f32 %v1228_v18, %v687_v45  ;;  %v708_v51 = vmul.f32 %v1228_v18, %v669_v46  ;;  %v685_v52 = vld [vmem:[#allocation2 + $0xa8] sm:$0xff]  ;;  %v780_v54 = vmax.f32 %v748_v42, 0.0  ;;  %v312_v1 = vld [vmem:[#allocation2 + $0xe0] sm:$0xff] }
 0x101   : > { %656 = vst.msk [vmem:[#allocation2 + $0xd8] sm:$0xff] %vm251_vm2, %v623_v39  ;;  %638 = vst.msk [vmem:[#allocation2 + $0x48] sm:$0xff] %vm251_vm2, %v605_v40  ;;  %v762_v55 = vadd.f32 %v1233_v28, %v723_v43  ;;  %v749_v56 = vadd.f32 %v1233_v28, %v710_v44  ;;  %v724_v57 = vmul.f32 %v1228_v18, %v685_v52  ;;  %v796_v60 = vmax.f32 %v764_v48, 0.0  ;;  %v989_v0 = vpop.f32.mrb[12].mxu0  ;;  %v299_v2 = vld [vmem:[#allocation2 + $0x78] sm:$0xff]  ;;  %v297_v10 = vld [vmem:[#allocation2 + $0x68] sm:$0xff] }
 0x102   : > { %654 = vst.msk [vmem:[#allocation2 + $0xc8] sm:$0xff] %vm251_vm2, %v621_v47  ;;  %v778_v61 = vmax.f32 %v746_v49, 0.0  ;;  %v765_v62 = vadd.f32 %v1233_v28, %v726_v50  ;;  %v747_v63 = vadd.f32 %v1233_v28, %v708_v51  ;;  %812 = vst.msk [vmem:[%s1251_s9 + $0x30] sm:$0xff] %vm251_vm2, %v780_v54  ;;  %v610_v6 = vadd.f32 %v989_v0, %v298_v53  ;;  %v1005_v7 = vpop.f32.mrb[12].mxu1  ;;  %v517_v8 = vpop.f32.mrb[13].mxu0  ;;  %v315_v9 = vld [vmem:[#allocation2 + $0xf8] sm:$0xff] }
 0x103   : > { %v794_v3 = vmax.f32 %v762_v55, 0.0  ;;  %v781_v4 = vmax.f32 %v749_v56, 0.0  ;;  %v763_v5 = vadd.f32 %v1233_v28, %v724_v57  ;;  %828 = vst.msk [vmem:[%s1251_s9 + $0xb0] sm:$0xff] %vm251_vm2, %v796_v60  ;;  %v626_v14 = vadd.f32 %v1005_v7, %v314_v58  ;;  %v581_v16 = vpop.f32.mrb[13].mxu1  ;;  %v990_v17 = vpop.f32.mrb[14].mxu0  ;;  %v313_v19 = vld [vmem:[#allocation2 + $0xe8] sm:$0xff] }
 0x104   : > { %810 = vst.msk [vmem:[%s1251_s9 + $0x20] sm:$0xff] %vm251_vm2, %v778_v61  ;;  %v797_v11 = vmax.f32 %v765_v62, 0.0  ;;  %v779_v12 = vmax.f32 %v747_v63, 0.0  ;;  %v674_v13 = vld [vmem:[#allocation2 + $0x50] sm:$0xff]  ;;  %v608_v15 = vadd.f32 %v517_v8, %v296_v59  ;;  %643 = vst.msk [vmem:[#allocation2 + $0x70] sm:$0xff] %vm251_vm2, %v610_v6  ;;  %v624_v24 = vadd.f32 %v581_v16, %v312_v1  ;;  %v1006_v26 = vpop.f32.mrb[14].mxu1 }
 0x105   : > { %826 = vst.msk [vmem:[%s1251_s9 + $0xa0] sm:$0xff] %vm251_vm2, %v794_v3  ;;  %813 = vst.msk [vmem:[%s1251_s9 + $0x38] sm:$0xff] %vm251_vm2, %v781_v4  ;;  %v795_v20 = vmax.f32 %v763_v5, 0.0  ;;  %v713_v21 = vmul.f32 %v1228_v18, %v674_v13  ;;  %v690_v22 = vld [vmem:[#allocation2 + $0xd0] sm:$0xff]  ;;  %v611_v25 = vadd.f32 %v990_v17, %v299_v2  ;;  %v520_v27 = vpop.f32.mrb[15].mxu0  ;;  %v627_v33 = vadd.f32 %v1006_v26, %v315_v9  ;;  %v584_v35 = vpop.f32.mrb[15].mxu1 }
 0x106   : > { %v672_v23 = vld [vmem:[#allocation2 + $0x40] sm:$0xff]  ;;  %829 = vst.msk [vmem:[%s1251_s9 + $0xb8] sm:$0xff] %vm251_vm2, %v797_v11  ;;  %811 = vst.msk [vmem:[%s1251_s9 + $0x28] sm:$0xff] %vm251_vm2, %v779_v12  ;;  %v729_v29 = vmul.f32 %v1228_v18, %v690_v22  ;;  %v609_v34 = vadd.f32 %v520_v27, %v297_v10  ;;  %v625_v41 = vadd.f32 %v584_v35, %v313_v19 }
 0x107   : > { %v711_v30 = vmul.f32 %v1228_v18, %v672_v23  ;;  %v688_v31 = vld [vmem:[#allocation2 + $0xc0] sm:$0xff]  ;;  %v675_v32 = vld [vmem:[#allocation2 + $0x58] sm:$0xff]  ;;  %659 = vst.msk [vmem:[#allocation2 + $0xf0] sm:$0xff] %vm251_vm2, %v626_v14  ;;  %641 = vst.msk [vmem:[#allocation2 + $0x60] sm:$0xff] %vm251_vm2, %v608_v15  ;;  %v752_v36 = vadd.f32 %v1233_v28, %v713_v21 }
 0x108   : > { %827 = vst.msk [vmem:[%s1251_s9 + $0xa8] sm:$0xff] %vm251_vm2, %v795_v20  ;;  %v727_v37 = vmul.f32 %v1228_v18, %v688_v31  ;;  %v714_v38 = vmul.f32 %v1228_v18, %v675_v32  ;;  %v691_v39 = vld [vmem:[#allocation2 + $0xd8] sm:$0xff]  ;;  %v673_v40 = vld [vmem:[#allocation2 + $0x48] sm:$0xff]  ;;  %657 = vst.msk [vmem:[#allocation2 + $0xe0] sm:$0xff] %vm251_vm2, %v624_v24  ;;  %v768_v42 = vadd.f32 %v1233_v28, %v729_v29 }
 0x109   : > { %644 = vst.msk [vmem:[#allocation2 + $0x78] sm:$0xff] %vm251_vm2, %v611_v25  ;;  %v750_v43 = vadd.f32 %v1233_v28, %v711_v30  ;;  %v730_v44 = vmul.f32 %v1228_v18, %v691_v39  ;;  %v712_v45 = vmul.f32 %v1228_v18, %v673_v40  ;;  %v689_v46 = vld [vmem:[#allocation2 + $0xc8] sm:$0xff]  ;;  %660 = vst.msk [vmem:[#allocation2 + $0xf8] sm:$0xff] %vm251_vm2, %v627_v33  ;;  %v784_v47 = vmax.f32 %v752_v36, 0.0 }
 0x10a   : > { %642 = vst.msk [vmem:[#allocation2 + $0x68] sm:$0xff] %vm251_vm2, %v609_v34  ;;  %v766_v48 = vadd.f32 %v1233_v28, %v727_v37  ;;  %v753_v49 = vadd.f32 %v1233_v28, %v714_v38  ;;  %v728_v50 = vmul.f32 %v1228_v18, %v689_v46  ;;  %658 = vst.msk [vmem:[#allocation2 + $0xe8] sm:$0xff] %vm251_vm2, %v625_v41  ;;  %v800_v51 = vmax.f32 %v768_v42, 0.0 }
 0x10b   : > { %v782_v52 = vmax.f32 %v750_v43, 0.0  ;;  %v769_v53 = vadd.f32 %v1233_v28, %v730_v44  ;;  %v751_v54 = vadd.f32 %v1233_v28, %v712_v45  ;;  %816 = vst.msk [vmem:[%s1251_s9 + $0x50] sm:$0xff] %vm251_vm2, %v784_v47  ;;  %v678_v60 = vld [vmem:[#allocation2 + $0x70] sm:$0xff] }
 0x10c   : > { %v798_v55 = vmax.f32 %v766_v48, 0.0  ;;  %v785_v56 = vmax.f32 %v753_v49, 0.0  ;;  %v767_v57 = vadd.f32 %v1233_v28, %v728_v50  ;;  %832 = vst.msk [vmem:[%s1251_s9 + $0xd0] sm:$0xff] %vm251_vm2, %v800_v51  ;;  %v717_v62 = vmul.f32 %v1228_v18, %v678_v60 }
 0x10d   : > { %814 = vst.msk [vmem:[%s1251_s9 + $0x40] sm:$0xff] %vm251_vm2, %v782_v52  ;;  %v801_v58 = vmax.f32 %v769_v53, 0.0  ;;  %v783_v59 = vmax.f32 %v751_v54, 0.0 }
 0x10e   : > { %830 = vst.msk [vmem:[%s1251_s9 + $0xc0] sm:$0xff] %vm251_vm2, %v798_v55  ;;  %817 = vst.msk [vmem:[%s1251_s9 + $0x58] sm:$0xff] %vm251_vm2, %v785_v56  ;;  %v799_v61 = vmax.f32 %v767_v57, 0.0  ;;  %v694_v63 = vld [vmem:[#allocation2 + $0xf0] sm:$0xff]  ;;  %v676_v0 = vld [vmem:[#allocation2 + $0x60] sm:$0xff]  ;;  %v756_v5 = vadd.f32 %v1233_v28, %v717_v62 }
 0x10f   : > { %833 = vst.msk [vmem:[%s1251_s9 + $0xd8] sm:$0xff] %vm251_vm2, %v801_v58  ;;  %815 = vst.msk [vmem:[%s1251_s9 + $0x48] sm:$0xff] %vm251_vm2, %v783_v59  ;;  %v733_v1 = vmul.f32 %v1228_v18, %v694_v63  ;;  %v715_v2 = vmul.f32 %v1228_v18, %v676_v0  ;;  %v692_v3 = vld [vmem:[#allocation2 + $0xe0] sm:$0xff] }
 0x110   : > { %v679_v4 = vld [vmem:[#allocation2 + $0x78] sm:$0xff]  ;;  %831 = vst.msk [vmem:[%s1251_s9 + $0xc8] sm:$0xff] %vm251_vm2, %v799_v61  ;;  %v731_v6 = vmul.f32 %v1228_v18, %v692_v3  ;;  %v788_v15 = vmax.f32 %v756_v5, 0.0 }
 0x111   : > { %v718_v7 = vmul.f32 %v1228_v18, %v679_v4  ;;  %v695_v8 = vld [vmem:[#allocation2 + $0xf8] sm:$0xff]  ;;  %v677_v9 = vld [vmem:[#allocation2 + $0x68] sm:$0xff]  ;;  %v772_v10 = vadd.f32 %v1233_v28, %v733_v1  ;;  %v754_v11 = vadd.f32 %v1233_v28, %v715_v2 }
 0x112   : > { %v734_v12 = vmul.f32 %v1228_v18, %v695_v8  ;;  %v716_v13 = vmul.f32 %v1228_v18, %v677_v9  ;;  %v693_v14 = vld [vmem:[#allocation2 + $0xe8] sm:$0xff]  ;;  %v770_v16 = vadd.f32 %v1233_v28, %v731_v6  ;;  %820 = vst.msk [vmem:[%s1251_s9 + $0x70] sm:$0xff] %vm251_vm2, %v788_v15 }
 0x113   : > { %v757_v17 = vadd.f32 %v1233_v28, %v718_v7  ;;  %v732_v19 = vmul.f32 %v1228_v18, %v693_v14  ;;  %v804_v20 = vmax.f32 %v772_v10, 0.0  ;;  %v786_v21 = vmax.f32 %v754_v11, 0.0 }
 0x114   : > { %v773_v22 = vadd.f32 %v1233_v28, %v734_v12  ;;  %v755_v23 = vadd.f32 %v1233_v28, %v716_v13  ;;  %v802_v24 = vmax.f32 %v770_v16, 0.0 }
 0x115   : > { %v789_v25 = vmax.f32 %v757_v17, 0.0  ;;  %v771_v26 = vadd.f32 %v1233_v28, %v732_v19  ;;  %836 = vst.msk [vmem:[%s1251_s9 + $0xf0] sm:$0xff] %vm251_vm2, %v804_v20  ;;  %818 = vst.msk [vmem:[%s1251_s9 + $0x60] sm:$0xff] %vm251_vm2, %v786_v21 }
 0x116   : > { %v805_v18 = vmax.f32 %v773_v22, 0.0  ;;  %v787_v27 = vmax.f32 %v755_v23, 0.0  ;;  %834 = vst.msk [vmem:[%s1251_s9 + $0xe0] sm:$0xff] %vm251_vm2, %v802_v24 }
 0x117   : > { %821 = vst.msk [vmem:[%s1251_s9 + $0x78] sm:$0xff] %vm251_vm2, %v789_v25  ;;  %v803_v29 = vmax.f32 %v771_v26, 0.0 }
 0x118   : > { %837 = vst.msk [vmem:[%s1251_s9 + $0xf8] sm:$0xff] %vm251_vm2, %v805_v18  ;;  %819 = vst.msk [vmem:[%s1251_s9 + $0x68] sm:$0xff] %vm251_vm2, %v787_v27 }
 0x119   : > { %835 = vst.msk [vmem:[%s1251_s9 + $0xe8] sm:$0xff] %vm251_vm2, %v803_v29 }
 0x11a PF: > { %s14_s17 = sadd.s32 1, %s1061_s17   ;;  %s1409_s15 = smov %s1057_s16 }
 0x11b   : > { %p11_p5 = scmp.ge.s32.totalorder %s14_s17, 4   ;;  %s1410_s16 = smov %s1412_s18 }
 0x11d   :  { %13 = sbr.rel (!%p11_p5) target bundleno = 2 (0x2), region = 77 }

</bundles_post_ra>
